<compile_context>
chip_gen: v7x
topology: tpu7x:2x2x1
jax: 0.10.0
libtpu: 0.0.40
codegen_flags: <defaults>
</compile_context>

<pallas_src>
import functools

import jax
import jax.numpy as jnp
from jax.experimental import pallas as pl
from jax.experimental.pallas import tpu as pltpu

LANE = 128     # pad feature dims to multiples of the lane width
SUBLANE = 8    # f32 sublane: batch tile must be a multiple of this


def _round_up(n: int, m: int) -> int:
    return ((n + m - 1) // m) * m


# ----------------------------------------------------------------------------
# Kernel body: whole MLP chained in one grid step, intermediates stay in
# vregs/VMEM. refs = (x_ref, w1_ref, b1_ref, ..., wL_ref, bL_ref, o_ref).
# ----------------------------------------------------------------------------
def _fused_mlp_kernel(*refs, n_layers: int, compute_dtype):
    x_ref = refs[0]
    o_ref = refs[-1]
    wb = refs[1:-1]

    h = x_ref[...].astype(compute_dtype)
    for i in range(n_layers):
        w_ref = wb[2 * i]
        b_ref = wb[2 * i + 1]
        # MXU matmul, forced f32 accumulation.
        y = jnp.dot(h, w_ref[...], preferred_element_type=jnp.float32)
        y = y + b_ref[...]                 # bias (1, N) broadcasts, f32
        if i < n_layers - 1:
            h = jnp.tanh(y).astype(compute_dtype)   # f32 tanh -> EUP slot
        else:
            h = y
    o_ref[...] = h.astype(o_ref.dtype)


# ----------------------------------------------------------------------------
# One-time parameter preparation (hoisted out of the per-call path).
# ----------------------------------------------------------------------------
def prepare_mlp_params(params, compute_dtype=jnp.float32):
    """Zero-pad feature dims to multiples of 128 and cast once.

    params: list of (w, b), w shape (fan_in, fan_out), b shape (fan_out,).
    Returns a list of (w_padded, b_padded) ready for mlp_forward_fused.
    Padding is exact: zero rows/cols contribute 0, tanh(0)=0.
    """
    padded = []
    in_pad = _round_up(params[0][0].shape[0], LANE)
    for (w, b) in params:
        fan_in, fan_out = w.shape
        out_pad = _round_up(fan_out, LANE)
        w_p = jnp.zeros((in_pad, out_pad), compute_dtype)
        w_p = w_p.at[:fan_in, :fan_out].set(w.astype(compute_dtype))
        b_p = jnp.zeros((1, out_pad), jnp.float32)          # bias stays f32
        b_p = b_p.at[:, :fan_out].set(b.astype(jnp.float32))
        padded.append((w_p, b_p))
        in_pad = out_pad
    return padded


# ----------------------------------------------------------------------------
# Fused forward.
# ----------------------------------------------------------------------------
def mlp_forward_fused(padded_params, x, *, out_features,
                      compute_dtype=jnp.float32, batch_tile: int = 512):
    """Single pallas_call for all Linear(+Tanh) layers.

    padded_params: output of prepare_mlp_params (pre-padded, pre-cast).
    x: (batch, in_features) with in_features <= padded fan_in of layer 0.
    out_features: true (unpadded) width of the final layer.
    """
    B, K = x.shape
    n_layers = len(padded_params)
    K_pad = padded_params[0][0].shape[0]
    N_pad = padded_params[-1][0].shape[1]
    assert K <= K_pad

    cbytes = jnp.dtype(compute_dtype).itemsize
    obytes = jnp.dtype(x.dtype).itemsize
    widths = [K_pad] + [w.shape[1] for (w, _) in padded_params]
    max_width = max(widths)

    # --- batch tile selection ------------------------------------------------
    # Cap TM so 2 * TM * max_width * 4B of live intermediates stays ~<=4 MiB.
    tm_cap = max(SUBLANE, ((4 << 20) // (8 * max_width)) // SUBLANE * SUBLANE)
    tm_req = max(SUBLANE, min(_round_up(batch_tile, SUBLANE), tm_cap))
    B8 = _round_up(B, SUBLANE)
    if B8 <= tm_req:
        # Whole batch fits in one tile; prefer a 2-step grid so v7x's two
        # TensorCores both get work (the batch axis is "parallel").
        if B8 >= 2 * SUBLANE and (B8 // 2) % SUBLANE == 0:
            TM = B8 // 2
        else:
            TM = B8
    else:
        TM = tm_req
    grid = pl.cdiv(B8, TM)
    B_pad = grid * TM

    # --- pad activations (batch-dependent, so done per call) -----------------
    x_pad = jnp.zeros((B_pad, K_pad), compute_dtype)
    x_pad = x_pad.at[:B, :K].set(x.astype(compute_dtype))

    # --- specs: weights/biases VMEM-resident, single-buffered ----------------
    flat_wb = []
    wb_specs = []
    for (w_p, b_p) in padded_params:
        flat_wb += [w_p, b_p]
        wb_specs += [
            pl.BlockSpec(w_p.shape, lambda i: (0, 0),
                         pipeline_mode=pl.Buffered(1)),
            pl.BlockSpec(b_p.shape, lambda i: (0, 0),
                         pipeline_mode=pl.Buffered(1)),
        ]

    # --- VMEM budget (resident weights x1, x/out double-buffered, scratch) ---
    w_bytes = sum(w.size * w.dtype.itemsize + b.size * b.dtype.itemsize
                  for (w, b) in padded_params)
    act_bytes = 2 * TM * K_pad * cbytes + 2 * TM * N_pad * obytes
    inter_bytes = 2 * TM * max_width * 4
    vmem_limit = int(1.25 * (w_bytes + act_bytes + inter_bytes))
    vmem_limit = min(max(vmem_limit, 4 << 20), 100 << 20)

    # --- advisory cost estimate ----------------------------------------------
    flops = 2 * B_pad * sum(w.shape[0] * w.shape[1] for (w, _) in padded_params)
    transcend = B_pad * sum(w.shape[1] for (w, _) in padded_params[:-1])
    bytes_acc = (x_pad.size * cbytes + B_pad * N_pad * obytes + w_bytes)
    cost = pl.CostEstimate(flops=flops, transcendentals=transcend,
                           bytes_accessed=bytes_acc)

    kernel = functools.partial(_fused_mlp_kernel, n_layers=n_layers,
                               compute_dtype=compute_dtype)

    out = pl.pallas_call(
        kernel,
        out_shape=jax.ShapeDtypeStruct((B_pad, N_pad), x.dtype),
        grid=(grid,),
        in_specs=[pl.BlockSpec((TM, K_pad), lambda i: (i, 0))] + wb_specs,
        out_specs=pl.BlockSpec((TM, N_pad), lambda i: (i, 0)),
        compiler_params=pltpu.CompilerParams(
            dimension_semantics=("parallel",),
            vmem_limit_bytes=vmem_limit),
        cost_estimate=cost,
    )(x_pad, *flat_wb)

    return out[:B, :out_features]


# ----------------------------------------------------------------------------
# Init / reference (mirrors nn.Linear default init and MLP forward).
# ----------------------------------------------------------------------------
def init_mlp_params(key, sizes, dtype=jnp.float32):
    params = []
    for i in range(len(sizes) - 1):
        fan_in, fan_out = sizes[i], sizes[i + 1]
        key, kw, kb = jax.random.split(key, 3)
        bound = 1.0 / (fan_in ** 0.5)
        w = jax.random.uniform(kw, (fan_in, fan_out), dtype,
                               minval=-bound, maxval=bound)
        b = jax.random.uniform(kb, (fan_out,), dtype,
                               minval=-bound, maxval=bound)
        params.append((w, b))
    return params


def mlp_reference(params, x):
    n_layers = len(params)
    for i, (w, b) in enumerate(params):
        x = x @ w + b
        if i < n_layers - 1:
            x = jnp.tanh(x)
    return x


if __name__ == "__main__":
    key = jax.random.PRNGKey(0)
    sizes = (32, 64, 48, 16)   # MLP((32, 64, 48, 16)): Linear/Tanh/Linear/Tanh/Linear
    batch = 64

    kx, kp = jax.random.split(key)
    x = jax.random.normal(kx, (batch, sizes[0]), jnp.float32)
    params = init_mlp_params(kp, sizes)
    ref = mlp_reference(params, x)

    # --- f32 path: exact vs reference (1e-5) --------------------------------
    padded_f32 = prepare_mlp_params(params, jnp.float32)   # pad ONCE, outside jit
    fwd_f32 = jax.jit(functools.partial(
        mlp_forward_fused, out_features=sizes[-1], compute_dtype=jnp.float32))
    out_f32 = jax.block_until_ready(fwd_f32(padded_f32, x))
    assert out_f32.shape == (batch, sizes[-1])
    assert jnp.allclose(out_f32, ref, atol=1e-5, rtol=1e-5)

    # --- bf16 MXU-operand path (v6e/v7x fast path; f32 accum/bias/tanh) ------
    padded_bf16 = prepare_mlp_params(params, jnp.bfloat16)
    fwd_bf16 = jax.jit(functools.partial(
        mlp_forward_fused, out_features=sizes[-1], compute_dtype=jnp.bfloat16))
    out_bf16 = jax.block_until_ready(fwd_bf16(padded_bf16, x))
    assert out_bf16.shape == (batch, sizes[-1])
    assert jnp.allclose(out_bf16.astype(jnp.float32), ref, atol=5e-2, rtol=5e-2)

    print("KERNEL_OK")
</pallas_src>

<mosaic_0001>
module attributes {stable_mosaic.version = 11 : i64} {
  func.func @_fused_mlp_kernel(%arg0: i32, %arg1: memref<32x128xf32, #tpu.memory_space<vmem>>, %arg2: memref<128x128xf32, #tpu.memory_space<vmem>>, %arg3: memref<1x128xf32, #tpu.memory_space<vmem>>, %arg4: memref<128x128xf32, #tpu.memory_space<vmem>>, %arg5: memref<1x128xf32, #tpu.memory_space<vmem>>, %arg6: memref<128x128xf32, #tpu.memory_space<vmem>>, %arg7: memref<1x128xf32, #tpu.memory_space<vmem>>, %arg8: memref<32x128xf32, #tpu.memory_space<vmem>>) attributes {dimension_semantics = [#tpu.dimension_semantics<parallel>], iteration_bounds = array<i64: 2>, scalar_prefetch = 0 : i64, scratch_operands = 0 : i64, tpu.core_type = #tpu.core_type<tc>, window_params = [{transform_indices = @transform_0, window_bounds = array<i64: 32, 128>}, {pipeline_mode = #tpu.pipeline_mode<synchronous>, transform_indices = @transform_1, window_bounds = array<i64: 128, 128>}, {pipeline_mode = #tpu.pipeline_mode<synchronous>, transform_indices = @transform_2, window_bounds = array<i64: 1, 128>}, {pipeline_mode = #tpu.pipeline_mode<synchronous>, transform_indices = @transform_3, window_bounds = array<i64: 128, 128>}, {pipeline_mode = #tpu.pipeline_mode<synchronous>, transform_indices = @transform_4, window_bounds = array<i64: 1, 128>}, {pipeline_mode = #tpu.pipeline_mode<synchronous>, transform_indices = @transform_5, window_bounds = array<i64: 128, 128>}, {pipeline_mode = #tpu.pipeline_mode<synchronous>, transform_indices = @transform_6, window_bounds = array<i64: 1, 128>}, {transform_indices = @transform_7, window_bounds = array<i64: 32, 128>}]} {
    %c0 = arith.constant 0 : index
    %c0_0 = arith.constant 0 : index
    %0 = vector.load %arg1[%c0, %c0_0] : memref<32x128xf32, #tpu.memory_space<vmem>>, vector<32x128xf32>
    %c0_1 = arith.constant 0 : index
    %c0_2 = arith.constant 0 : index
    %1 = vector.load %arg2[%c0_1, %c0_2] : memref<128x128xf32, #tpu.memory_space<vmem>>, vector<128x128xf32>
    %cst = arith.constant dense<0.000000e+00> : vector<32x128xf32>
    %2 = tpu.matmul %0, %1, %cst {dimension_numbers = #tpu.dot_dimension_numbers<[1], [0], [0], [1], [0, 0, 1, 1], [], []>} : vector<32x128xf32>, vector<128x128xf32>, vector<32x128xf32> -> vector<32x128xf32>
    %c0_3 = arith.constant 0 : index
    %c0_4 = arith.constant 0 : index
    %3 = vector.load %arg3[%c0_3, %c0_4] : memref<1x128xf32, #tpu.memory_space<vmem>>, vector<1x128xf32>
    %4 = vector.broadcast %3 : vector<1x128xf32> to vector<32x128xf32>
    %5 = arith.addf %2, %4 : vector<32x128xf32>
    %6 = math.tanh %5 : vector<32x128xf32>
    %c0_5 = arith.constant 0 : index
    %c0_6 = arith.constant 0 : index
    %7 = vector.load %arg4[%c0_5, %c0_6] : memref<128x128xf32, #tpu.memory_space<vmem>>, vector<128x128xf32>
    %cst_7 = arith.constant dense<0.000000e+00> : vector<32x128xf32>
    %8 = tpu.matmul %6, %7, %cst_7 {dimension_numbers = #tpu.dot_dimension_numbers<[1], [0], [0], [1], [0, 0, 1, 1], [], []>} : vector<32x128xf32>, vector<128x128xf32>, vector<32x128xf32> -> vector<32x128xf32>
    %c0_8 = arith.constant 0 : index
    %c0_9 = arith.constant 0 : index
    %9 = vector.load %arg5[%c0_8, %c0_9] : memref<1x128xf32, #tpu.memory_space<vmem>>, vector<1x128xf32>
    %10 = vector.broadcast %9 : vector<1x128xf32> to vector<32x128xf32>
    %11 = arith.addf %8, %10 : vector<32x128xf32>
    %12 = math.tanh %11 : vector<32x128xf32>
    %c0_10 = arith.constant 0 : index
    %c0_11 = arith.constant 0 : index
    %13 = vector.load %arg6[%c0_10, %c0_11] : memref<128x128xf32, #tpu.memory_space<vmem>>, vector<128x128xf32>
    %cst_12 = arith.constant dense<0.000000e+00> : vector<32x128xf32>
    %14 = tpu.matmul %12, %13, %cst_12 {dimension_numbers = #tpu.dot_dimension_numbers<[1], [0], [0], [1], [0, 0, 1, 1], [], []>} : vector<32x128xf32>, vector<128x128xf32>, vector<32x128xf32> -> vector<32x128xf32>
    %c0_13 = arith.constant 0 : index
    %c0_14 = arith.constant 0 : index
    %15 = vector.load %arg7[%c0_13, %c0_14] : memref<1x128xf32, #tpu.memory_space<vmem>>, vector<1x128xf32>
    %16 = vector.broadcast %15 : vector<1x128xf32> to vector<32x128xf32>
    %17 = arith.addf %14, %16 : vector<32x128xf32>
    %c0_15 = arith.constant 0 : index
    %c0_16 = arith.constant 0 : index
    %18 = vector.load %arg8[%c0_15, %c0_16] : memref<32x128xf32, #tpu.memory_space<vmem>>, vector<32x128xf32>
    tpu.vector_store %arg8[%c0_15, %c0_16], %17 {strides = array<i32>} : memref<32x128xf32, #tpu.memory_space<vmem>>, vector<32x128xf32>,
    return
  }
  func.func @transform_0(%arg0: i32) -> (i32, i32) {
    %c0_i32 = arith.constant 0 : i32
    %c0_i32_0 = arith.constant 0 : i32
    return %arg0, %c0_i32 : i32, i32
  }
  func.func @transform_1(%arg0: i32) -> (i32, i32) {
    %c0_i32 = arith.constant 0 : i32
    %c0_i32_0 = arith.constant 0 : i32
    %c0_i32_1 = arith.constant 0 : i32
    return %c0_i32, %c0_i32_0 : i32, i32
  }
  func.func @transform_2(%arg0: i32) -> (i32, i32) {
    %c0_i32 = arith.constant 0 : i32
    %c0_i32_0 = arith.constant 0 : i32
    %c0_i32_1 = arith.constant 0 : i32
    return %c0_i32, %c0_i32_0 : i32, i32
  }
  func.func @transform_3(%arg0: i32) -> (i32, i32) {
    %c0_i32 = arith.constant 0 : i32
    %c0_i32_0 = arith.constant 0 : i32
    %c0_i32_1 = arith.constant 0 : i32
    return %c0_i32, %c0_i32_0 : i32, i32
  }
  func.func @transform_4(%arg0: i32) -> (i32, i32) {
    %c0_i32 = arith.constant 0 : i32
    %c0_i32_0 = arith.constant 0 : i32
    %c0_i32_1 = arith.constant 0 : i32
    return %c0_i32, %c0_i32_0 : i32, i32
  }
  func.func @transform_5(%arg0: i32) -> (i32, i32) {
    %c0_i32 = arith.constant 0 : i32
    %c0_i32_0 = arith.constant 0 : i32
    %c0_i32_1 = arith.constant 0 : i32
    return %c0_i32, %c0_i32_0 : i32, i32
  }
  func.func @transform_6(%arg0: i32) -> (i32, i32) {
    %c0_i32 = arith.constant 0 : i32
    %c0_i32_0 = arith.constant 0 : i32
    %c0_i32_1 = arith.constant 0 : i32
    return %c0_i32, %c0_i32_0 : i32, i32
  }
  func.func @transform_7(%arg0: i32) -> (i32, i32) {
    %c0_i32 = arith.constant 0 : i32
    %c0_i32_0 = arith.constant 0 : i32
    return %arg0, %c0_i32 : i32, i32
  }
}

</mosaic_0001>

<bundles_post_ra>
// kernel: mlp_forward_fused.1
= control target key start
LH: loop header
LB: loop body
LE: loop exit
PB: predicated region body
PF: predicated region fallthrough
CT: control target
= control target key end

     0   :  { %12 = vsyncpa [#allocation3], 0  ;;  %s1127_s24 = smov 0   ;;  %s1304_s0 = inlined_call_operand.vmem [shape: f32[64,128], index: 0, kind: input, shape index: {}]   ;;  %s1305_s1 = inlined_call_operand.vmem [shape: f32[128,128], index: 1, kind: input, shape index: {}]   ;;  %s1306_s2 = inlined_call_operand.vmem [shape: f32[1,128], index: 2, kind: input, shape index: {}]   ;;  %s1307_s3 = inlined_call_operand.vmem [shape: f32[128,128], index: 3, kind: input, shape index: {}]   ;;  %s1308_s4 = inlined_call_operand.vmem [shape: f32[1,128], index: 4, kind: input, shape index: {}]   ;;  %s1309_s5 = inlined_call_operand.hbm [shape: f32[128,128], index: 5, kind: input, shape index: {}]   ;;  %s1310_s6 = inlined_call_operand.vmem [shape: f32[1,128], index: 6, kind: input, shape index: {}]   ;;  %s1311_s7 = inlined_call_operand.vmem [shape: f32[64,128], index: 7, kind: output, shape index: {}]  }
   0x1 LB: > { %s705_s25 = sadd.s32 4294967295, %s1082_s24   ;;  %p707_p0 = scmp.ge.s32.totalorder %s1082_s24, 1  ;;  %s1082_s24 = sphi %s1127_s24, %s18_s24  }
   0x2   : > { %p201_p1 = scmp.lt.s32.totalorder %s1082_s24, 3  ;;  %s1084_s26 = smov [#allocation2]  }
   0x3   : > { %s225_s27 = sshll.u32 %s1084_s26, 4  ;;  %p1141_p3 = scmp.eq.s32.totalorder %s705_s25, 0  ;;  %s226_s27 = int_to_ptr.vmem [resolvable:$true] %s225_s27 }
   0x4   : > { %p1135_p2 = pnand %p707_p0, %p201_p1  ;;  %s1044_s10 = scalar_lea.hbm %s1309_s5, 2048 }
   0x5   : > { %s1316_s29 = scalar_select %p1141_p3, 1, 0 }
   0x6   : > { %s1315_s28 = scalar_select %p1135_p2, 1, 0 }
   0x7   : > { %p1011_p4 = pneg %p1135_p2  ;;  %p1045_p6 = scmp.ne.s32.totalorder %s1309_s5, %s1044_s10 }
   0x8   : > { %p1051_p10 = scmp.lt.u32.totalorder %s1044_s10, %s1309_s5 }
   0x9   : > { %p1149_p5 = pnand %p1141_p3, %p1011_p4 }
   0xb   : > { %p1046_p7 = pneg %p1149_p5 }
   0xd   : > { %p1047_p8 = pnand %p1046_p7, %p1045_p6 }
   0xf   : > { %p1048_p9 = pneg %p1047_p8 }
  0x11   : > { %p1053_p11 = pnand %p1051_p10, %p1048_p9 }
  0x13   : > { %1056 = shalt.err (!%p1053_p11)
}
  0x14   : > { %s1057_s15 = scalar_lea.vmem %s226_s27, 2048  ;;  %p1065_p1 = scmp.lt.s32.totalorder %s226_s27, %s226_s27 }
  0x15   : > { %p1058_p12 = scmp.ne.s32.totalorder %s226_s27, %s1057_s15  ;;  %p1066_p4 = scmp.lt.s32.totalorder %s1057_s15, %s1057_s15 }
  0x17   : > { %p1060_p13 = pnand %p1058_p12, %p1046_p7  ;;  %p1067_p3 = por %p1066_p4, %p1065_p1 }
  0x19   : > { %p1061_p0 = pneg %p1060_p13 }
  0x1b   : > { %p1068_p2 = pnand %p1067_p3, %p1061_p0 }
  0x1d   : > { %1071 = shalt.err (!%p1068_p2)
}
  0x1e   : > { %s1085_s16 = smov 128   ;;  %s1086_s17 = smov 8  }
  0x1f   : > { %1014 = dma.hbm_to_vmem [thread:$0]  (!%p1149_p5), %s1309_s5, 2048, %s226_s27, [#allocation3], %s1085_s16, %s1085_s16, %s1086_s17  }
  0x20   : > { %p1318_p6 = scmp.ne.s32.totalorder %s1315_s28, 0 }
  0x21   : > { %p1319_p8 = scmp.ne.s32.totalorder (!%p1318_p6), %s1316_s29, 0 }
  0x22   : > { %253 = sbr.rel (%p1318_p6) target bundleno = 751 (0x2ef), region = 48 }
  0x29   : > { %1077 = dma.done.wait (%p1319_p8), [#allocation3], 2048  }
  0x2a   : > { %1079 = vsyncadd (%p1319_p8), [#allocation3], 4294965248  ;;  %s712_s20 = sshll.u32 %s705_s25, 2  ;;  %v301_v0 = vld [vmem:[%s1305_s1] sm:$0xff]  ;;  %v302_v1 = vld [vmem:[%s1305_s1 + $0x8] sm:$0xff] }
  0x2b   : > { %p286_p2 = scmp.lt.s32.totalorder %s712_s20, 7  ;;  %v303_v2 = vld [vmem:[%s1305_s1 + $0x10] sm:$0xff]  ;;  %v895_v3 = vpack.c.bf16 %v302_v1, %v301_v0  ;;  %v304_v4 = vld [vmem:[%s1305_s1 + $0x18] sm:$0xff]  ;;  %v305_v6 = vld [vmem:[%s1305_s1 + $0x20] sm:$0xff] }
  0x2c   : > { %v899_v5 = vpack.c.bf16 %v304_v4, %v303_v2  ;;  %v306_v7 = vld [vmem:[%s1305_s1 + $0x28] sm:$0xff]  ;;  %v307_v10 = vld [vmem:[%s1305_s1 + $0x30] sm:$0xff]  ;;  %v308_v11 = vld [vmem:[%s1305_s1 + $0x38] sm:$0xff] }
  0x2d   : > { %s1321_s20 = smov (!%p286_p2, %s712_s20), 7  ;;  %896 = vmatprep.subr.bf16.mxu0 %v895_v3  ;;  %v903_v8 = vpack.c.bf16 %v306_v7, %v305_v6  ;;  %v413_v12 = vld [vmem:[%s1307_s3] sm:$0xff]  ;;  %v414_v13 = vld [vmem:[%s1307_s3 + $0x8] sm:$0xff]  ;;  %v415_v14 = vld [vmem:[%s1307_s3 + $0x10] sm:$0xff]  ;;  %v907_v18 = vpack.c.bf16 %v308_v11, %v307_v10 }
  0x2e   : > { %s713_s21 = sshll.u32 %s1321_s20, 3  ;;  %898 = vmatpush3.bf16.msra.mxu0 %v895_v3  ;;  %v416_v15 = vld [vmem:[%s1307_s3 + $0x18] sm:$0xff]  ;;  %v927_v16 = vpack.c.bf16 %v414_v13, %v413_v12  ;;  %v417_v19 = vld [vmem:[%s1307_s3 + $0x20] sm:$0xff]  ;;  %v418_v20 = vld [vmem:[%s1307_s3 + $0x28] sm:$0xff] }
  0x2f   : > { %s1203_s14 = scalar_lea.vmem %s1304_s0, %s713_s21  ;;  %900 = vmatprep.subr.bf16.mxu0 %v899_v5  ;;  %v931_v17 = vpack.c.bf16 %v416_v15, %v415_v14  ;;  %v309_v21 = vld [vmem:[%s1305_s1 + $0x40] sm:$0xff]  ;;  %v310_v22 = vld [vmem:[%s1305_s1 + $0x48] sm:$0xff]  ;;  %v935_v23 = vpack.c.bf16 %v418_v20, %v417_v19  ;;  %v419_v25 = vld [vmem:[%s1307_s3 + $0x30] sm:$0xff]  ;;  %s295_s17 = scalar_lea.vmem %s1311_s7, %s713_s21 }
  0x30   : > { %v297_v9 = vld [vmem:[%s1203_s14] sm:$0xff]  ;;  %928 = vmatprep.subr.bf16.mxu1 %v927_v16  ;;  %v911_v24 = vpack.c.bf16 %v310_v22, %v309_v21  ;;  %v420_v26 = vld [vmem:[%s1307_s3 + $0x38] sm:$0xff]  ;;  %v311_v27 = vld [vmem:[%s1305_s1 + $0x50] sm:$0xff] }
  0x31   : > { %813 = vmatprep.mubr.f32.mxu0 %v297_v9  ;;  %930 = vmatpush3.bf16.msra.mxu1 %v927_v16  ;;  %v312_v28 = vld [vmem:[%s1305_s1 + $0x58] sm:$0xff]  ;;  %v939_v29 = vpack.c.bf16 %v420_v26, %v419_v25  ;;  %v313_v31 = vld [vmem:[%s1305_s1 + $0x60] sm:$0xff]  ;;  %v314_v32 = vld [vmem:[%s1305_s1 + $0x68] sm:$0xff] }
  0x32   : > { %902 = vmatpush3.bf16.msra.mxu0 %v899_v5  ;;  %932 = vmatprep.subr.bf16.mxu1 %v931_v17  ;;  %v915_v30 = vpack.c.bf16 %v312_v28, %v311_v27  ;;  %v919_v33 = vpack.c.bf16 %v314_v32, %v313_v31  ;;  %v315_v34 = vld [vmem:[%s1305_s1 + $0x70] sm:$0xff]  ;;  %v316_v35 = vld [vmem:[%s1305_s1 + $0x78] sm:$0xff]  ;;  %v298_v37 = vld [vmem:[%s1203_s14 + $0x8] sm:$0xff] }
  0x33   : > { %904 = vmatprep.subr.bf16.mxu0 %v903_v8  ;;  %v923_v36 = vpack.c.bf16 %v316_v35, %v315_v34  ;;  %v299_v38 = vld [vmem:[%s1203_s14 + $0x10] sm:$0xff]  ;;  %v300_v39 = vld [vmem:[%s1203_s14 + $0x18] sm:$0xff]  ;;  %v421_v40 = vld [vmem:[%s1307_s3 + $0x40] sm:$0xff] }
  0x34   : > { %v422_v41 = vld [vmem:[%s1307_s3 + $0x48] sm:$0xff]  ;;  %v423_v43 = vld [vmem:[%s1307_s3 + $0x50] sm:$0xff]  ;;  %v424_v44 = vld [vmem:[%s1307_s3 + $0x58] sm:$0xff] }
  0x35   : > { %934 = vmatpush3.bf16.msra.mxu1 %v931_v17  ;;  %v943_v42 = vpack.c.bf16 %v422_v41, %v421_v40  ;;  %v947_v45 = vpack.c.bf16 %v424_v44, %v423_v43  ;;  %v425_v46 = vld [vmem:[%s1307_s3 + $0x60] sm:$0xff]  ;;  %v426_v47 = vld [vmem:[%s1307_s3 + $0x68] sm:$0xff]  ;;  %v427_v49 = vld [vmem:[%s1307_s3 + $0x70] sm:$0xff] }
  0x36   : > { %906 = vmatpush3.bf16.msra.mxu0 %v903_v8  ;;  %936 = vmatprep.subr.bf16.mxu1 %v935_v23  ;;  %v951_v48 = vpack.c.bf16 %v426_v47, %v425_v46  ;;  %v428_v50 = vld [vmem:[%s1307_s3 + $0x78] sm:$0xff]  ;;  %v525_v52 = vld [vmem:[#allocation2] sm:$0xff]  ;;  %v526_v53 = vld [vmem:[#allocation2 + $0x8] sm:$0xff] }
  0x37   : > { %908 = vmatprep.subr.bf16.mxu0 %v907_v18  ;;  %v955_v51 = vpack.c.bf16 %v428_v50, %v427_v49  ;;  %v527_v54 = vld [vmem:[#allocation2 + $0x10] sm:$0xff]  ;;  %v959_v55 = vpack.c.bf16 %v526_v53, %v525_v52  ;;  %v528_v56 = vld [vmem:[#allocation2 + $0x18] sm:$0xff]  ;;  %v529_v58 = vld [vmem:[#allocation2 + $0x20] sm:$0xff] }
  0x38   : > { %v963_v57 = vpack.c.bf16 %v528_v56, %v527_v54  ;;  %v530_v59 = vld [vmem:[#allocation2 + $0x28] sm:$0xff]  ;;  %v531_v61 = vld [vmem:[#allocation2 + $0x30] sm:$0xff]  ;;  %v532_v62 = vld [vmem:[#allocation2 + $0x38] sm:$0xff] }
  0x39   : > { %938 = vmatpush3.bf16.msra.mxu1 %v935_v23  ;;  %v967_v60 = vpack.c.bf16 %v530_v59, %v529_v58  ;;  %v971_v63 = vpack.c.bf16 %v532_v62, %v531_v61  ;;  %v716_v0 = vld [vmem:[%s1306_s2] ss:$0 sm:$0xff]  ;;  %v534_v14 = vld [vmem:[#allocation2 + $0x48] sm:$0xff]  ;;  %v535_v16 = vld [vmem:[#allocation2 + $0x50] sm:$0xff] }
  0x3a   : > { %910 = vmatpush3.bf16.msra.mxu0 %v907_v18  ;;  %940 = vmatprep.subr.bf16.mxu1 %v939_v29  ;;  %v533_v13 = vld [vmem:[#allocation2 + $0x40] sm:$0xff]  ;;  %v536_v17 = vld [vmem:[#allocation2 + $0x58] sm:$0xff]  ;;  %v538_v20 = vld [vmem:[#allocation2 + $0x68] sm:$0xff] }
  0x3b   : > { %912 = vmatprep.subr.bf16.mxu0 %v911_v24  ;;  %v975_v15 = vpack.c.bf16 %v534_v14, %v533_v13  ;;  %v979_v18 = vpack.c.bf16 %v536_v17, %v535_v16  ;;  %v537_v19 = vld [vmem:[#allocation2 + $0x60] sm:$0xff]  ;;  %v539_v22 = vld [vmem:[#allocation2 + $0x70] sm:$0xff]  ;;  %v540_v23 = vld [vmem:[#allocation2 + $0x78] sm:$0xff] }
  0x3c   : > { %v983_v21 = vpack.c.bf16 %v538_v20, %v537_v19  ;;  %v717_v25 = vld [vmem:[%s1308_s4] ss:$0 sm:$0xff] }
  0x3d   : > { %942 = vmatpush3.bf16.msra.mxu1 %v939_v29 }
  0x3e   : > { %914 = vmatpush3.bf16.msra.mxu0 %v911_v24  ;;  %944 = vmatprep.subr.bf16.mxu1 %v943_v42  ;;  %v987_v24 = vpack.c.bf16 %v540_v23, %v539_v22 }
  0x3f   : > { %916 = vmatprep.subr.bf16.mxu0 %v915_v30 }
  0x41   : > { %946 = vmatpush3.bf16.msra.mxu1 %v943_v42 }
  0x42   : > { %918 = vmatpush3.bf16.msra.mxu0 %v915_v30  ;;  %948 = vmatprep.subr.bf16.mxu1 %v947_v45 }
  0x43   : > { %920 = vmatprep.subr.bf16.mxu0 %v919_v33 }
  0x45   : > { %950 = vmatpush3.bf16.msra.mxu1 %v947_v45 }
  0x46   : > { %922 = vmatpush3.bf16.msra.mxu0 %v919_v33  ;;  %952 = vmatprep.subr.bf16.mxu1 %v951_v48 }
  0x47   : > { %924 = vmatprep.subr.bf16.mxu0 %v923_v36 }
  0x49   : > { %954 = vmatpush3.bf16.msra.mxu1 %v951_v48 }
  0x4a   : > { %926 = vmatpush3.bf16.msra.mxu0 %v923_v36  ;;  %956 = vmatprep.subr.bf16.mxu1 %v955_v51 }
  0x4b   : > { %960 = vmatprep.subr.bf16.mxu0 %v959_v55 }
  0x4d   : > { %814 = vmatmul.mubr.f32.vlgmr.msra.gmra.mrb[0].mxu0 %v298_v37  ;;  %958 = vmatpush3.bf16.msra.mxu1 %v955_v51 }
  0x4e   : > { %816 = vmatprep.mubr.f32.mxu0 %v299_v38  ;;  %991 = vmatprep.subr.bf16.mxu1 %v959_v55  ;;  %v718_v38 = vld [vmem:[%s1310_s6] ss:$0 sm:$0xff] }
  0x4f   : > { %962 = vmatpush3.bf16.msra.mxu0 %v959_v55 }
  0x50   : > { %964 = vmatprep.subr.bf16.mxu0 %v963_v57 }
  0x51   : > { %817 = vmatmul.mubr.f32.gmra.mrb[2].mxu0 %v300_v39 }
  0x53   : > { %966 = vmatpush3.bf16.msra.mxu0 %v963_v57 }
  0x54   : > { %968 = vmatprep.subr.bf16.mxu0 %v967_v60 }
  0x57   : > { %970 = vmatpush3.bf16.msra.mxu0 %v967_v60 }
  0x58   : > { %972 = vmatprep.subr.bf16.mxu0 %v971_v63 }
  0x5b   : > { %974 = vmatpush3.bf16.msra.mxu0 %v971_v63 }
  0x5c   : > { %976 = vmatprep.subr.bf16.mxu0 %v975_v15 }
  0x5f   : > { %978 = vmatpush3.bf16.msra.mxu0 %v975_v15 }
  0x60   : > { %980 = vmatprep.subr.bf16.mxu0 %v979_v18 }
  0x63   : > { %982 = vmatpush3.bf16.msra.mxu0 %v979_v18 }
  0x64   : > { %984 = vmatprep.subr.bf16.mxu0 %v983_v21 }
  0x67   : > { %986 = vmatpush3.bf16.msra.mxu0 %v983_v21 }
  0x68   : > { %988 = vmatprep.subr.bf16.mxu0 %v987_v24 }
  0x6b   : > { %990 = vmatpush3.bf16.msra.mxu0 %v987_v24 }
 0x120   : > { %v815_v1 = vpop.f32.mrb[0].mxu0 }
 0x121   : > { %v396_v2 = vadd.f32 %v815_v1, %v716_v0  ;;  %v390_v3 = vpop.f32.mrb[1].mxu0 }
 0x122   : > { %v391_v4 = vadd.f32 %v716_v0, %v390_v3 }
 0x124   : > { %1028 = vtanh.f32 %v391_v4  ;;  %v818_v5 = vpop.f32.mrb[2].mxu0 }
 0x125   : > { %1030 = vtanh.f32 %v396_v2  ;;  %v406_v6 = vadd.f32 %v818_v5, %v716_v0  ;;  %v400_v7 = vpop.f32.mrb[3].mxu0 }
 0x126   : > { %v401_v8 = vadd.f32 %v716_v0, %v400_v7 }
 0x128   : > { %1032 = vtanh.f32 %v401_v8 }
 0x129   : > { %1034 = vtanh.f32 %v406_v6 }
 0x12e   : > { %v1029_v9 = vpop.eup %1028 }
 0x12f   : > { %v1031_v10 = vpop.eup %1030  ;;  %851 = vmatprep.mubr.f32.mxu1 %v1029_v9 }
 0x130   : > { %852 = vmatmul.mubr.f32.vlgmr.msra.gmra.mrb[0].mxu1 %v1031_v10 }
 0x131   : > { %999 = vmatpush3.bf16.msra.mxu1 %v959_v55 }
 0x132   : > { %v1033_v11 = vpop.eup %1032  ;;  %992 = vmatprep.subr.bf16.mxu1 %v963_v57 }
 0x133   : > { %v1035_v12 = vpop.eup %1034  ;;  %854 = vmatprep.mubr.f32.mxu1 %v1033_v11 }
 0x134   : > { %855 = vmatmul.mubr.f32.gmra.mrb[2].mxu1 %v1035_v12 }
 0x135   : > { %1000 = vmatpush3.bf16.msra.mxu1 %v963_v57 }
 0x136   : > { %993 = vmatprep.subr.bf16.mxu1 %v967_v60 }
 0x139   : > { %1001 = vmatpush3.bf16.msra.mxu1 %v967_v60 }
 0x13a   : > { %994 = vmatprep.subr.bf16.mxu1 %v971_v63 }
 0x13d   : > { %1002 = vmatpush3.bf16.msra.mxu1 %v971_v63 }
 0x13e   : > { %995 = vmatprep.subr.bf16.mxu1 %v975_v15 }
 0x141   : > { %1003 = vmatpush3.bf16.msra.mxu1 %v975_v15 }
 0x142   : > { %996 = vmatprep.subr.bf16.mxu1 %v979_v18 }
 0x145   : > { %1004 = vmatpush3.bf16.msra.mxu1 %v979_v18 }
 0x146   : > { %997 = vmatprep.subr.bf16.mxu1 %v983_v21 }
 0x149   : > { %1005 = vmatpush3.bf16.msra.mxu1 %v983_v21 }
 0x14a   : > { %998 = vmatprep.subr.bf16.mxu1 %v987_v24 }
 0x14d   : > { %1006 = vmatpush3.bf16.msra.mxu1 %v987_v24 }
 0x203   : > { %v853_v26 = vpop.f32.mrb[0].mxu1 }
 0x204   : > { %v508_v27 = vadd.f32 %v853_v26, %v717_v25  ;;  %v502_v28 = vpop.f32.mrb[1].mxu1 }
 0x205   : > { %v503_v29 = vadd.f32 %v717_v25, %v502_v28 }
 0x207   : > { %1036 = vtanh.f32 %v503_v29  ;;  %v856_v30 = vpop.f32.mrb[2].mxu1 }
 0x208   : > { %1038 = vtanh.f32 %v508_v27  ;;  %v518_v31 = vadd.f32 %v856_v30, %v717_v25  ;;  %v512_v32 = vpop.f32.mrb[3].mxu1 }
 0x209   : > { %v513_v33 = vadd.f32 %v717_v25, %v512_v32 }
 0x20b   : > { %1040 = vtanh.f32 %v513_v33 }
 0x20c   : > { %1042 = vtanh.f32 %v518_v31 }
 0x211   : > { %v1037_v34 = vpop.eup %1036 }
 0x212   : > { %v1039_v35 = vpop.eup %1038  ;;  %889 = vmatprep.mubr.f32.mxu0 %v1037_v34 }
 0x213   : > { %890 = vmatmul.mubr.f32.vlgmr.msra.gmra.mrb[4].mxu0 %v1039_v35 }
 0x215   : > { %v1041_v36 = vpop.eup %1040 }
 0x216   : > { %v1043_v37 = vpop.eup %1042  ;;  %892 = vmatprep.mubr.f32.mxu1 %v1041_v36 }
 0x217   : > { %893 = vmatmul.mubr.f32.vlgmr.msra.gmra.mrb[4].mxu1 %v1043_v37 }
 0x2e6   : > { %v891_v39 = vpop.f32.mrb[4].mxu0 }
 0x2e7   : > { %v614_v40 = vpop.f32.mrb[5].mxu0  ;;  %v620_v42 = vadd.f32 %v891_v39, %v718_v38 }
 0x2e8   : > { %v615_v41 = vadd.f32 %v718_v38, %v614_v40 }
 0x2e9   : > { %634 = vst [vmem:[%s295_s17 + $0x8] sm:$0xff] %v620_v42 }
 0x2ea   : > { %633 = vst [vmem:[%s295_s17] sm:$0xff] %v615_v41  ;;  %v894_v43 = vpop.f32.mrb[4].mxu1 }
 0x2eb   : > { %v624_v44 = vpop.f32.mrb[5].mxu1  ;;  %v630_v46 = vadd.f32 %v894_v43, %v718_v38 }
 0x2ec   : > { %v625_v45 = vadd.f32 %v718_v38, %v624_v44 }
 0x2ed   : > { %636 = vst [vmem:[%s295_s17 + $0x18] sm:$0xff] %v630_v46 }
 0x2ee   : > { %635 = vst [vmem:[%s295_s17 + $0x10] sm:$0xff] %v625_v45 }
 0x2ef PF: > { %s18_s24 = sadd.s32 1, %s1082_s24  }
 0x2f0   : > { %p15_p3 = scmp.ge.s32.totalorder %s18_s24, 4  }
 0x2f2   :  { %17 = sbr.rel (!%p15_p3) target bundleno = 1 (0x1), region = 83 }
 0x2f9   :  { %659 = vsyncpa [#allocation3], 1 }
 0x2fa   :  { %661 = vsyncpa [#allocation3 + $0x1], 1 }

</bundles_post_ra>
